<compile_context>
chip_gen: v7x
topology: tpu7x:2x2x1
jax: 0.10.0
libtpu: 0.0.40
codegen_flags: <defaults>
</compile_context>

<pallas_src>
import functools

import jax
import jax.numpy as jnp
from jax.experimental import pallas as pl
from jax.experimental.pallas import tpu as pltpu

LANES = 128
SUBLANES = 8


def _pinn_loss_kernel(coef_ref, vec_ref, lib_ref, out_ref, acc_ref,
                      *, n_total, kesi, n_terms):
    """Grid axis 0 iterates over row-tiles (sequential reduction axis).

    coef_ref : SMEM (K,)            library coefficients
    vec_ref  : VMEM (3, tr, 128)    [prediction, h_data, H_t] tile
    lib_ref  : VMEM (K, tr, 128)    Library tile, K-major
    out_ref  : SMEM (1,)            scalar loss
    acc_ref  : VMEM (tr, 128)       fused elementwise partial sums
    """
    i = pl.program_id(0)

    @pl.when(i == 0)
    def _init():
        acc_ref[...] = jnp.zeros_like(acc_ref)

    # f1 partial: (prediction - h_data)^2 (pure VPU, lane-dense vregs).
    d = vec_ref[0] - vec_ref[1]

    # f2 partial: res = H_t - sum_k coef[k] * Library[:, k]
    # K scalar-broadcast FMAs over full-lane vregs; coef read from SMEM.
    res = vec_ref[2]
    for k in range(n_terms):
        res = res - coef_ref[k] * lib_ref[k]

    # Single fused accumulator: sum(d^2) + kesi * sum(res^2), accumulated
    # elementwise (no per-step cross-lane reduce).
    acc_ref[...] = acc_ref[...] + (d * d + kesi * (res * res))

    @pl.when(i == pl.num_programs(0) - 1)
    def _finalize():
        out_ref[0] = jnp.sum(acc_ref[...]) * (1.0 / float(n_total))


def _choose_tile_rows(rows, k, target_tile_rows):
    """Pick a row-tile size: big tiles, single-buffer input tile <= ~8 MiB."""
    bytes_per_row = (3 + k) * LANES * 4          # vecs + Library per padded row
    budget_rows = max(SUBLANES, (8 * 1024 * 1024) // max(bytes_per_row, 1))
    tr = min(target_tile_rows, budget_rows)
    if rows <= tr:
        return rows, 1                           # single tile == full extent (always legal)
    tr = max(SUBLANES, (tr // SUBLANES) * SUBLANES)  # multiple of 8 sublanes
    num_tiles = -(-rows // tr)
    return tr, num_tiles


def pinn_loss(prediction, h_data, H_t, coef, Library, *, kesi=0.01,
              target_tile_rows=1024):
    """Pallas implementation of PINNLossFunc.forward (iter is unused, as in the module)."""
    N = prediction.shape[0]
    K = Library.shape[1]

    rows = -(-N // LANES)                               # ceil(N / 128)
    tile_rows, num_tiles = _choose_tile_rows(rows, K, target_tile_rows)
    rows_padded = num_tiles * tile_rows
    n_pad = rows_padded * LANES
    pad = n_pad - N

    def to_lane_dense(x):
        x = jnp.asarray(x, jnp.float32).reshape(-1)
        if pad:
            x = jnp.pad(x, (0, pad))
        return x.reshape(rows_padded, LANES)

    # Stack the three (N,) vectors into one lane-dense (3, rows, 128) input.
    vecs = jnp.stack(
        [to_lane_dense(prediction), to_lane_dense(h_data), to_lane_dense(H_t)],
        axis=0)

    # Library: (N, K) -> K-major lane-dense (K, rows, 128). One-time transpose
    # in the wrapper; zero-padded tail rows contribute 0 to the residual.
    lib = jnp.asarray(Library, jnp.float32)
    if pad:
        lib = jnp.pad(lib, ((0, pad), (0, 0)))
    lib_t = lib.T.reshape(K, rows_padded, LANES)

    coef1d = jnp.asarray(coef, jnp.float32).reshape(-1)  # (K,) -> SMEM

    kernel = functools.partial(_pinn_loss_kernel, n_total=N, kesi=float(kesi),
                               n_terms=K)

    out = pl.pallas_call(
        kernel,
        out_shape=jax.ShapeDtypeStruct((1,), jnp.float32),
        grid_spec=pltpu.PrefetchScalarGridSpec(
            num_scalar_prefetch=0,
            grid=(num_tiles,),
            in_specs=[
                pl.BlockSpec(memory_space=pltpu.SMEM),                     # coef (K,)
                pl.BlockSpec((3, tile_rows, LANES), lambda i: (0, i, 0)),  # pred/h/H_t
                pl.BlockSpec((K, tile_rows, LANES), lambda i: (0, i, 0)),  # Library
            ],
            out_specs=pl.BlockSpec(memory_space=pltpu.SMEM),               # scalar loss
            scratch_shapes=[
                pltpu.VMEM((tile_rows, LANES), jnp.float32),               # fused partials
            ],
        ),
        compiler_params=pltpu.CompilerParams(
            dimension_semantics=("arbitrary",)),
    )(coef1d, vecs, lib_t)

    return out[0]


def pinn_loss_ref(prediction, h_data, H_t, coef, Library, kesi=0.01):
    f1 = jnp.mean((prediction - h_data) ** 2)
    res = H_t
    for i in range(Library.shape[1]):
        res = res - Library[:, i].reshape(Library.shape[0], 1) * coef[i]
    f2 = jnp.mean(res ** 2)
    return f1 + kesi * f2


if __name__ == "__main__":
    key = jax.random.PRNGKey(0)

    # --- Case 1: small shapes consistent with the module (single tile) ---
    N, K = 256, 8
    k1, k2, k3, k4, k5, k6 = jax.random.split(key, 6)
    prediction = jax.random.normal(k1, (N, 1), dtype=jnp.float32)
    h_data = jax.random.normal(k2, (N, 1), dtype=jnp.float32)   # "h_data_choose"
    H_t = jax.random.normal(k3, (N, 1), dtype=jnp.float32)
    Library = jax.random.normal(k4, (N, K), dtype=jnp.float32)
    coef = jax.random.normal(k5, (K,), dtype=jnp.float32)

    mse = jax.block_until_ready(pinn_loss(prediction, h_data, H_t, coef, Library))
    ref = pinn_loss_ref(prediction, h_data, H_t, coef, Library)
    assert jnp.allclose(mse, ref, rtol=1e-5, atol=1e-5), (mse, ref)

    # --- Case 2: exercises multi-tile grid + tail zero-padding ---
    N2, K2 = 3000, 5
    prediction2 = jax.random.normal(k6, (N2, 1), dtype=jnp.float32)
    h_data2 = jax.random.normal(k1, (N2, 1), dtype=jnp.float32)
    H_t2 = jax.random.normal(k2, (N2, 1), dtype=jnp.float32)
    Library2 = jax.random.normal(k3, (N2, K2), dtype=jnp.float32)
    coef2 = jax.random.normal(k4, (K2,), dtype=jnp.float32)

    mse2 = jax.block_until_ready(
        pinn_loss(prediction2, h_data2, H_t2, coef2, Library2, target_tile_rows=8))
    ref2 = pinn_loss_ref(prediction2, h_data2, H_t2, coef2, Library2)
    assert jnp.allclose(mse2, ref2, rtol=1e-5, atol=1e-5), (mse2, ref2)

    print("KERNEL_OK")
</pallas_src>

<mosaic_0001>
module attributes {stable_mosaic.version = 11 : i64} {
  func.func @_pinn_loss_kernel(%arg0: i32, %arg1: memref<8xf32, #tpu.memory_space<smem>>, %arg2: memref<3x2x128xf32, #tpu.memory_space<vmem>>, %arg3: memref<8x2x128xf32, #tpu.memory_space<vmem>>, %arg4: memref<1xf32, #tpu.memory_space<smem>>, %arg5: memref<2x128xf32, #tpu.memory_space<vmem>>) attributes {dimension_semantics = [#tpu.dimension_semantics<arbitrary>], iteration_bounds = array<i64: 1>, scalar_prefetch = 0 : i64, scratch_operands = 1 : i64, tpu.core_type = #tpu.core_type<tc>, window_params = [{transform_indices = @transform_0, window_bounds = array<i64: 8>}, {transform_indices = @transform_1, window_bounds = array<i64: 3, 2, 128>}, {transform_indices = @transform_2, window_bounds = array<i64: 8, 2, 128>}, {transform_indices = @transform_3, window_bounds = array<i64: 1>}]} {
    %c0_i32 = arith.constant 0 : i32
    %0 = arith.cmpi eq, %arg0, %c0_i32 : i32
    %1 = arith.extui %0 : i1 to i32
    %c0_i32_0 = arith.constant 0 : i32
    %2 = arith.cmpi ne, %1, %c0_i32_0 : i32
    scf.if %2 {
      %cst_40 = arith.constant 0.000000e+00 : f32
      %69 = vector.broadcast %cst_40 : f32 to vector<2x128xf32>
      %c0_41 = arith.constant 0 : index
      %c0_42 = arith.constant 0 : index
      %70 = vector.load %arg5[%c0_41, %c0_42] : memref<2x128xf32, #tpu.memory_space<vmem>>, vector<2x128xf32>
      tpu.vector_store %arg5[%c0_41, %c0_42], %69 {strides = array<i32>} : memref<2x128xf32, #tpu.memory_space<vmem>>, vector<2x128xf32>,
    } else {
    }
    %c0 = arith.constant 0 : index
    %c0_1 = arith.constant 0 : index
    %c0_2 = arith.constant 0 : index
    %3 = vector.load %arg2[%c0, %c0_1, %c0_2] : memref<3x2x128xf32, #tpu.memory_space<vmem>>, vector<1x2x128xf32>
    %4 = vector.shape_cast %3 : vector<1x2x128xf32> to vector<2x128xf32>
    %c1 = arith.constant 1 : index
    %c0_3 = arith.constant 0 : index
    %c0_4 = arith.constant 0 : index
    %5 = vector.load %arg2[%c1, %c0_3, %c0_4] : memref<3x2x128xf32, #tpu.memory_space<vmem>>, vector<1x2x128xf32>
    %6 = vector.shape_cast %5 : vector<1x2x128xf32> to vector<2x128xf32>
    %7 = arith.subf %4, %6 : vector<2x128xf32>
    %c2 = arith.constant 2 : index
    %c0_5 = arith.constant 0 : index
    %c0_6 = arith.constant 0 : index
    %8 = vector.load %arg2[%c2, %c0_5, %c0_6] : memref<3x2x128xf32, #tpu.memory_space<vmem>>, vector<1x2x128xf32>
    %9 = vector.shape_cast %8 : vector<1x2x128xf32> to vector<2x128xf32>
    %c0_7 = arith.constant 0 : index
    %10 = memref.load %arg1[%c0_7] : memref<8xf32, #tpu.memory_space<smem>>
    %c0_8 = arith.constant 0 : index
    %c0_9 = arith.constant 0 : index
    %c0_10 = arith.constant 0 : index
    %11 = vector.load %arg3[%c0_8, %c0_9, %c0_10] : memref<8x2x128xf32, #tpu.memory_space<vmem>>, vector<1x2x128xf32>
    %12 = vector.shape_cast %11 : vector<1x2x128xf32> to vector<2x128xf32>
    %13 = vector.broadcast %10 : f32 to vector<2x128xf32>
    %14 = arith.mulf %13, %12 : vector<2x128xf32>
    %15 = arith.subf %9, %14 : vector<2x128xf32>
    %c1_11 = arith.constant 1 : index
    %16 = memref.load %arg1[%c1_11] : memref<8xf32, #tpu.memory_space<smem>>
    %c1_12 = arith.constant 1 : index
    %c0_13 = arith.constant 0 : index
    %c0_14 = arith.constant 0 : index
    %17 = vector.load %arg3[%c1_12, %c0_13, %c0_14] : memref<8x2x128xf32, #tpu.memory_space<vmem>>, vector<1x2x128xf32>
    %18 = vector.shape_cast %17 : vector<1x2x128xf32> to vector<2x128xf32>
    %19 = vector.broadcast %16 : f32 to vector<2x128xf32>
    %20 = arith.mulf %19, %18 : vector<2x128xf32>
    %21 = arith.subf %15, %20 : vector<2x128xf32>
    %c2_15 = arith.constant 2 : index
    %22 = memref.load %arg1[%c2_15] : memref<8xf32, #tpu.memory_space<smem>>
    %c2_16 = arith.constant 2 : index
    %c0_17 = arith.constant 0 : index
    %c0_18 = arith.constant 0 : index
    %23 = vector.load %arg3[%c2_16, %c0_17, %c0_18] : memref<8x2x128xf32, #tpu.memory_space<vmem>>, vector<1x2x128xf32>
    %24 = vector.shape_cast %23 : vector<1x2x128xf32> to vector<2x128xf32>
    %25 = vector.broadcast %22 : f32 to vector<2x128xf32>
    %26 = arith.mulf %25, %24 : vector<2x128xf32>
    %27 = arith.subf %21, %26 : vector<2x128xf32>
    %c3 = arith.constant 3 : index
    %28 = memref.load %arg1[%c3] : memref<8xf32, #tpu.memory_space<smem>>
    %c3_19 = arith.constant 3 : index
    %c0_20 = arith.constant 0 : index
    %c0_21 = arith.constant 0 : index
    %29 = vector.load %arg3[%c3_19, %c0_20, %c0_21] : memref<8x2x128xf32, #tpu.memory_space<vmem>>, vector<1x2x128xf32>
    %30 = vector.shape_cast %29 : vector<1x2x128xf32> to vector<2x128xf32>
    %31 = vector.broadcast %28 : f32 to vector<2x128xf32>
    %32 = arith.mulf %31, %30 : vector<2x128xf32>
    %33 = arith.subf %27, %32 : vector<2x128xf32>
    %c4 = arith.constant 4 : index
    %34 = memref.load %arg1[%c4] : memref<8xf32, #tpu.memory_space<smem>>
    %c4_22 = arith.constant 4 : index
    %c0_23 = arith.constant 0 : index
    %c0_24 = arith.constant 0 : index
    %35 = vector.load %arg3[%c4_22, %c0_23, %c0_24] : memref<8x2x128xf32, #tpu.memory_space<vmem>>, vector<1x2x128xf32>
    %36 = vector.shape_cast %35 : vector<1x2x128xf32> to vector<2x128xf32>
    %37 = vector.broadcast %34 : f32 to vector<2x128xf32>
    %38 = arith.mulf %37, %36 : vector<2x128xf32>
    %39 = arith.subf %33, %38 : vector<2x128xf32>
    %c5 = arith.constant 5 : index
    %40 = memref.load %arg1[%c5] : memref<8xf32, #tpu.memory_space<smem>>
    %c5_25 = arith.constant 5 : index
    %c0_26 = arith.constant 0 : index
    %c0_27 = arith.constant 0 : index
    %41 = vector.load %arg3[%c5_25, %c0_26, %c0_27] : memref<8x2x128xf32, #tpu.memory_space<vmem>>, vector<1x2x128xf32>
    %42 = vector.shape_cast %41 : vector<1x2x128xf32> to vector<2x128xf32>
    %43 = vector.broadcast %40 : f32 to vector<2x128xf32>
    %44 = arith.mulf %43, %42 : vector<2x128xf32>
    %45 = arith.subf %39, %44 : vector<2x128xf32>
    %c6 = arith.constant 6 : index
    %46 = memref.load %arg1[%c6] : memref<8xf32, #tpu.memory_space<smem>>
    %c6_28 = arith.constant 6 : index
    %c0_29 = arith.constant 0 : index
    %c0_30 = arith.constant 0 : index
    %47 = vector.load %arg3[%c6_28, %c0_29, %c0_30] : memref<8x2x128xf32, #tpu.memory_space<vmem>>, vector<1x2x128xf32>
    %48 = vector.shape_cast %47 : vector<1x2x128xf32> to vector<2x128xf32>
    %49 = vector.broadcast %46 : f32 to vector<2x128xf32>
    %50 = arith.mulf %49, %48 : vector<2x128xf32>
    %51 = arith.subf %45, %50 : vector<2x128xf32>
    %c7 = arith.constant 7 : index
    %52 = memref.load %arg1[%c7] : memref<8xf32, #tpu.memory_space<smem>>
    %c7_31 = arith.constant 7 : index
    %c0_32 = arith.constant 0 : index
    %c0_33 = arith.constant 0 : index
    %53 = vector.load %arg3[%c7_31, %c0_32, %c0_33] : memref<8x2x128xf32, #tpu.memory_space<vmem>>, vector<1x2x128xf32>
    %54 = vector.shape_cast %53 : vector<1x2x128xf32> to vector<2x128xf32>
    %55 = vector.broadcast %52 : f32 to vector<2x128xf32>
    %56 = arith.mulf %55, %54 : vector<2x128xf32>
    %57 = arith.subf %51, %56 : vector<2x128xf32>
    %c0_34 = arith.constant 0 : index
    %c0_35 = arith.constant 0 : index
    %58 = vector.load %arg5[%c0_34, %c0_35] : memref<2x128xf32, #tpu.memory_space<vmem>>, vector<2x128xf32>
    %59 = arith.mulf %7, %7 : vector<2x128xf32>
    %60 = arith.mulf %57, %57 : vector<2x128xf32>
    %cst = arith.constant 0.00999999977 : f32
    %61 = vector.broadcast %cst : f32 to vector<2x128xf32>
    %62 = arith.mulf %61, %60 : vector<2x128xf32>
    %63 = arith.addf %59, %62 : vector<2x128xf32>
    %64 = arith.addf %58, %63 : vector<2x128xf32>
    %c0_36 = arith.constant 0 : index
    %c0_37 = arith.constant 0 : index
    %65 = vector.load %arg5[%c0_36, %c0_37] : memref<2x128xf32, #tpu.memory_space<vmem>>, vector<2x128xf32>
    tpu.vector_store %arg5[%c0_36, %c0_37], %64 {strides = array<i32>} : memref<2x128xf32, #tpu.memory_space<vmem>>, vector<2x128xf32>,
    %c0_i32_38 = arith.constant 0 : i32
    %66 = arith.cmpi eq, %arg0, %c0_i32_38 : i32
    %67 = arith.extui %66 : i1 to i32
    %c0_i32_39 = arith.constant 0 : i32
    %68 = arith.cmpi ne, %67, %c0_i32_39 : i32
    scf.if %68 {
      %c0_40 = arith.constant 0 : index
      %c0_41 = arith.constant 0 : index
      %69 = vector.load %arg5[%c0_40, %c0_41] : memref<2x128xf32, #tpu.memory_space<vmem>>, vector<2x128xf32>
      %70 = vector.shape_cast %69 : vector<2x128xf32> to vector<1x2x128xf32>
      %cst_42 = arith.constant dense<0.000000e+00> : vector<1xf32>
      %71 = vector.multi_reduction <add>, %70, %cst_42 [1, 2] : vector<1x2x128xf32> to vector<1xf32>
      %72 = vector.shape_cast %71 : vector<1xf32> to vector<1x1x1xf32>
      %73 = vector.extract %72[0, 0, 0] : f32 from vector<1x1x1xf32>
      %cst_43 = arith.constant 3.906250e-03 : f32
      %74 = arith.mulf %73, %cst_43 : f32
      %c0_44 = arith.constant 0 : index
      %75 = memref.load %arg4[%c0_44] : memref<1xf32, #tpu.memory_space<smem>>
      memref.store %74, %arg4[%c0_44] : memref<1xf32, #tpu.memory_space<smem>>
    } else {
    }
    return
  }
  func.func @transform_0(%arg0: i32) -> i32 {
    %c0_i32 = arith.constant 0 : i32
    %c0_i32_0 = arith.constant 0 : i32
    return %c0_i32 : i32
  }
  func.func @transform_1(%arg0: i32) -> (i32, i32, i32) {
    %c0_i32 = arith.constant 0 : i32
    %c0_i32_0 = arith.constant 0 : i32
    %c0_i32_1 = arith.constant 0 : i32
    return %c0_i32, %arg0, %c0_i32_0 : i32, i32, i32
  }
  func.func @transform_2(%arg0: i32) -> (i32, i32, i32) {
    %c0_i32 = arith.constant 0 : i32
    %c0_i32_0 = arith.constant 0 : i32
    %c0_i32_1 = arith.constant 0 : i32
    return %c0_i32, %arg0, %c0_i32_0 : i32, i32, i32
  }
  func.func @transform_3(%arg0: i32) -> i32 {
    %c0_i32 = arith.constant 0 : i32
    %c0_i32_0 = arith.constant 0 : i32
    return %c0_i32 : i32
  }
}

</mosaic_0001>

<bundles_post_ra>
// kernel: tpu_custom_call.1
= control target key start
LH: loop header
LB: loop body
LE: loop exit
PB: predicated region body
PF: predicated region fallthrough
CT: control target
= control target key end

     0   :  { %8 = vsyncpa [#allocation5], 0  ;;  %s316_s0 = inlined_call_operand.hbm [shape: f32[8], index: 0, kind: input, shape index: {}]   ;;  %s317_s1 = inlined_call_operand.hbm [shape: f32[3,2,128], index: 1, kind: input, shape index: {}]   ;;  %s318_s2 = inlined_call_operand.hbm [shape: f32[8,2,128], index: 2, kind: input, shape index: {}]   ;;  %s319_s3 = inlined_call_operand.hbm [shape: f32[1], index: 3, kind: output, shape index: {}]  }
   0x1   :  { %9 = vsyncpa [#allocation4], 0 }
   0x2   :  { %10 = vsyncpa [#allocation9], 0 }
   0x3   :  { %11 = vsyncpa [#allocation6], 0  ;;  %s169_s14 = scalar_lea.hbm %s316_s0, 16 }
   0x4   :  { %p170_p0 = scmp.ne.s32.totalorder %s316_s0, %s169_s14  ;;  %p173_p1 = scmp.lt.u32.totalorder %s169_s14, %s316_s0 }
   0x6   :  { %p175_p2 = pnand %p173_p1, %p170_p0 }
   0x8   :  { %178 = shalt.err (!%p175_p2)
}
   0x9   :  { %s241_s19 = smov [#allocation3]   ;;  %s242_s22 = smov [#allocation7]  }
   0xa   :  { %19 = dma.hbm_to_smem %s316_s0, 16, %s241_s19, [#allocation5]  }
   0xb   :  { %s25_s23 = sshll.u32 %s242_s22, 4  ;;  %s179_s26 = scalar_lea.hbm %s317_s1, 96  ;;  %s26_s23 = int_to_ptr.vmem [resolvable:$true] %s25_s23 }
   0xc   :  { %p180_p3 = scmp.ne.s32.totalorder %s317_s1, %s179_s26  ;;  %p183_p4 = scmp.lt.u32.totalorder %s179_s26, %s317_s1 }
   0xe   :  { %p185_p5 = pnand %p183_p4, %p180_p3 }
  0x10   :  { %188 = shalt.err (!%p185_p5)
}
  0x11   :  { %s189_s4 = scalar_lea.vmem %s26_s23, 96  ;;  %p194_p7 = scmp.lt.s32.totalorder %s26_s23, %s26_s23 }
  0x12   :  { %p190_p6 = scmp.ne.s32.totalorder %s26_s23, %s189_s4  ;;  %p195_p8 = scmp.lt.s32.totalorder %s189_s4, %s189_s4 }
  0x14   :  { %p196_p9 = por %p195_p8, %p194_p7 }
  0x16   :  { %p197_p10 = pnand %p196_p9, %p190_p6 }
  0x18   :  { %200 = shalt.err (!%p197_p10)
}
  0x19   :  { %s243_s0 = smov 32   ;;  %s244_s5 = smov 2  }
  0x1a   :  { %31 = dma.hbm_to_vmem [thread:$0]  %s317_s1, 96, %s26_s23, [#allocation4], %s243_s0, %s243_s0, %s244_s5  }
  0x1b   :  { %s245_s8 = smov [#allocation8]   ;;  %s201_s12 = scalar_lea.hbm %s318_s2, 256 }
  0x1c   :  { %s37_s9 = sshll.u32 %s245_s8, 4  ;;  %p202_p11 = scmp.ne.s32.totalorder %s318_s2, %s201_s12  ;;  %s38_s9 = int_to_ptr.vmem [resolvable:$true] %s37_s9 }
  0x1d   :  { %p205_p12 = scmp.lt.u32.totalorder %s201_s12, %s318_s2 }
  0x1f   :  { %p207_p13 = pnand %p205_p12, %p202_p11 }
  0x21   :  { %210 = shalt.err (!%p207_p13)
}
  0x22   :  { %s211_s17 = scalar_lea.vmem %s38_s9, 256  ;;  %p216_p1 = scmp.lt.s32.totalorder %s38_s9, %s38_s9 }
  0x23   :  { %p212_p0 = scmp.ne.s32.totalorder %s38_s9, %s211_s17  ;;  %p217_p2 = scmp.lt.s32.totalorder %s211_s17, %s211_s17 }
  0x25   :  { %p218_p3 = por %p217_p2, %p216_p1 }
  0x27   :  { %p219_p4 = pnand %p218_p3, %p212_p0 }
  0x29   :  { %222 = shalt.err (!%p219_p4)
}
  0x2a   :  { %43 = dma.hbm_to_vmem [thread:$0]  %s318_s2, 256, %s38_s9, [#allocation9], %s243_s0, %s243_s0, %s244_s5  }
  0x2b   :  { %233 = dma.done.wait [#allocation5], 16  }
  0x2c   :  { %234 = vsyncadd [#allocation5], 4294967280 }
  0x2d   :  { %235 = dma.done.wait [#allocation4], 96  }
  0x2e   :  { %236 = vsyncadd [#allocation4], 4294967200 }
  0x2f   :  { %237 = dma.done.wait [#allocation9], 256  }
  0x30   :  { %238 = vsyncadd [#allocation9], 4294967040 }
  0x31   :  { %53 = sfence }
  0x32   :  { %v246_v0 = vmov 0.0   ;;  %s65_s19 = sld [smem:[#allocation3]]  ;;  %s153_s20 = sld [smem:[#allocation3 + $0x1]]  ;;  %v66_v1 = vld [vmem:[#allocation8] sm:$0x3]  ;;  %vm123_vm0 = vcmask 1041408  }
  0x33   :  { %58 = vst [vmem:[#allocation2] sm:$0x3] %v246_v0  ;;  %s154_s21 = sld [smem:[#allocation3 + $0x2]]  ;;  %s155_s22 = sld [smem:[#allocation3 + $0x3]]  ;;  %v72_v2 = vld [vmem:[#allocation8 + $0x2] sm:$0x3] }
  0x34   :  { %s156_s23 = sld [smem:[#allocation3 + $0x4]]  ;;  %s157_s24 = sld [smem:[#allocation3 + $0x5]]  ;;  %v64_v3 = vld [vmem:[#allocation7 + $0x4] sm:$0x3]  ;;  %v78_v5 = vld [vmem:[#allocation8 + $0x4] sm:$0x3] }
  0x35   :  { %s158_s2 = sld [smem:[#allocation3 + $0x6]]  ;;  %v84_v10 = vld [vmem:[#allocation8 + $0x6] sm:$0x3]  ;;  %s159_s25 = sld [smem:[#allocation3 + $0x7]]  ;;  %v90_v14 = vld [vmem:[#allocation8 + $0x8] sm:$0x3] }
  0x36   :  { %v96_v18 = vld [vmem:[#allocation8 + $0xa] sm:$0x3]  ;;  %v102_v22 = vld [vmem:[#allocation8 + $0xc] sm:$0x3]  ;;  %v108_v26 = vld [vmem:[#allocation8 + $0xe] sm:$0x3] }
  0x37   :  { %v59_v30 = vld [vmem:[#allocation7] sm:$0x3]  ;;  %v61_v31 = vld [vmem:[#allocation7 + $0x2] sm:$0x3]  ;;  %s223_s30 = scalar_lea.hbm %s319_s3, 16 }
  0x38   :  { %v67_v4 = vstv %s65_s19  ;;  %v73_v7 = vstv %s153_s20  ;;  %v62_v34 = vsub.f32 %v59_v30, %v61_v31  ;;  %p224_p5 = scmp.ne.s32.totalorder %s319_s3, %s223_s30  ;;  %p227_p6 = scmp.lt.u32.totalorder %s223_s30, %s319_s3 }
  0x39   :  { %v68_v6 = vmul.f32 %v67_v4, %v66_v1  ;;  %v79_v8 = vstv %s154_s21  ;;  %v74_v9 = vmul.f32 %v73_v7, %v72_v2  ;;  %v85_v11 = vstv %s155_s22 }
  0x3a   :  { %v80_v13 = vmul.f32 %v79_v8, %v78_v5  ;;  %v91_v15 = vstv %s156_s23  ;;  %v86_v17 = vmul.f32 %v85_v11, %v84_v10  ;;  %v97_v19 = vstv %s157_s24  ;;  %v112_v40 = vld [vmem:[#allocation2] sm:$0x3]  ;;  %p229_p7 = pnand %p227_p6, %p224_p5 }
  0x3b   :  { %v69_v12 = vsub.f32 %v64_v3, %v68_v6  ;;  %v92_v21 = vmul.f32 %v91_v15, %v90_v14  ;;  %v103_v23 = vstv %s158_s2  ;;  %v98_v25 = vmul.f32 %v97_v19, %v96_v18 }
  0x3c   :  { %v109_v27 = vstv %s159_s25  ;;  %v104_v29 = vmul.f32 %v103_v23, %v102_v22  ;;  %v113_v37 = vmul.f32 %v62_v34, %v62_v34 }
  0x3d   :  { %v75_v16 = vsub.f32 %v69_v12, %v74_v9  ;;  %v110_v33 = vmul.f32 %v109_v27, %v108_v26 }
  0x3f   :  { %v81_v20 = vsub.f32 %v75_v16, %v80_v13 }
  0x41   :  { %v87_v24 = vsub.f32 %v81_v20, %v86_v17 }
  0x43   :  { %v93_v28 = vsub.f32 %v87_v24, %v92_v21 }
  0x45   :  { %v99_v32 = vsub.f32 %v93_v28, %v98_v25 }
  0x47   :  { %v105_v35 = vsub.f32 %v99_v32, %v104_v29 }
  0x49   :  { %v111_v36 = vsub.f32 %v105_v35, %v110_v33 }
  0x4b   :  { %v114_v38 = vmul.f32 %v111_v36, %v111_v36 }
  0x4d   :  { %v115_v39 = vmul.f32 0.01, %v114_v38 }
  0x4f   :  { %v116_v41 = vadd.f32 %v115_v39, %v113_v37 }
  0x51   :  { %v117_v42 = vadd.f32 %v116_v41, %v112_v40 }
  0x53   :  { %118 = vst [vmem:[#allocation2] sm:$0x3] %v117_v42 }
  0x5a   :  { %v122_v43 = vld [vmem:[#allocation2] sm:$0x3] }
  0x5b   :  { %v124_v44 = vsel %vm123_vm0, %v122_v43, 0.0 }
  0x5c   :  { %125 = vadd.xlane.f32.xlu0 %v124_v44 }
  0xe9   :  { %v126_v45 = vpop.xlane.xlu0 %125 }
  0xea   :  { %v127_v46 = vrot.slane %v126_v45, 4 }
  0xec   :  { %v128_v47 = vadd.f32 %v127_v46, %v126_v45 }
  0xee   :  { %v129_v48 = vrot.slane %v128_v47, 2 }
  0xf0   :  { %v130_v49 = vadd.f32 %v129_v48, %v128_v47 }
  0xf2   :  { %v131_v50 = vrot.slane %v130_v49, 1 }
  0xf4   :  { %v132_v51 = vadd.f32 %v131_v50, %v130_v49 }
  0xf6   :  { %160 = vpush %v132_v51 }
 0x127   :  { %s161_s26 = spop %160 }
 0x128   :  { %s134_s27 = smul.f32 0.00390625, %s161_s26 }
 0x12a   :  { %136 = sst [smem:[#allocation10]] %s134_s27 }
 0x12b   :  { %232 = shalt.err (!%p229_p7)
}
 0x12c   :  { %s247_s7 = smov [#allocation10]  }
 0x12d   :  { %144 = dma.smem_to_hbm %s247_s7, 16, %s319_s3, [#allocation6]  }
 0x12e   :  { %239 = dma.done.wait [#allocation6], 16  }
 0x12f   :  { %240 = vsyncadd [#allocation6], 4294967280 }
 0x130   :  { %148 = sfence }
 0x131   :  { %149 = vsyncpa [#allocation4], 1 }
 0x132   :  { %150 = vsyncpa [#allocation9], 1 }
 0x133   :  { %151 = vsyncpa [#allocation5], 1 }
 0x134   :  { %152 = vsyncpa [#allocation6], 1 }

</bundles_post_ra>
